<compile_context>
chip_gen: v7x
topology: tpu7x:2x2x1
jax: 0.10.0
libtpu: 0.0.40
codegen_flags: <defaults>
</compile_context>

<pallas_src>
from functools import partial

import jax
import jax.numpy as jnp
from jax.experimental import pallas as pl
from jax.experimental.pallas import tpu as pltpu
from jax.scipy.linalg import block_diag


def _mha_kernel(*refs, num_heads, head_dim, scale, has_mask):
    if has_mask:
        (q_ref, k_ref, v_ref, m_ref,
         wq_ref, wk_ref, wv_ref, wo_ref, bo_ref, o_ref) = refs
    else:
        (q_ref, k_ref, v_ref,
         wq_ref, wk_ref, wv_ref, wo_ref, bo_ref, o_ref) = refs
        m_ref = None

    q = q_ref[0]              # (TQ, E)
    k = k_ref[0]              # (K,  E)
    v = v_ref[0]              # (K,  E)

    # Fused all-head projections: block-diagonal, pre-transposed (E, E)
    # weights -> one MXU matmul projects every head at once.  The softmax
    # scale is folded into Q (Q*D multiplies instead of Q*K).
    qp = jnp.dot(q, wq_ref[...], preferred_element_type=jnp.float32)
    qp = qp * jnp.float32(scale)
    kp = jnp.dot(k, wk_ref[...], preferred_element_type=jnp.float32)
    vp = jnp.dot(v, wv_ref[...], preferred_element_type=jnp.float32)

    if has_mask:
        keep = m_ref[0] != 0                      # (TQ, K), exact int compare

    ctx_heads = []
    for h in range(num_heads):                    # static unroll, H is small
        lo, hi = h * head_dim, (h + 1) * head_dim
        qh = qp[:, lo:hi]                         # (TQ, D)
        kh = kp[:, lo:hi]                         # (K,  D)
        vh = vp[:, lo:hi]                         # (K,  D)

        # energy = qh @ kh^T, contracting the last dim of both operands
        # (no transposed VMEM copy of kh).
        s = jax.lax.dot_general(
            qh, kh, (((1,), (1,)), ((), ())),
            preferred_element_type=jnp.float32)   # (TQ, K)
        if has_mask:
            s = jnp.where(keep, s, jnp.float32(-1e20))

        mx = jnp.max(s, axis=-1, keepdims=True)
        e = jnp.exp(s - mx)
        denom = jnp.sum(e, axis=-1, keepdims=True)
        attn = e * pl.reciprocal(denom, approx=True)       # EUP slot, ~free
        ctx_heads.append(
            jnp.dot(attn, vh, preferred_element_type=jnp.float32))  # (TQ, D)

    ctx = jnp.concatenate(ctx_heads, axis=-1)               # (TQ, E)

    # Fused fc_out: pre-transposed (in, out) weight, bias on the full tile.
    out = jnp.dot(ctx, wo_ref[...], preferred_element_type=jnp.float32)
    out = out + bo_ref[...]
    o_ref[...] = out[None].astype(o_ref.dtype)


def multi_head_attention(values, keys, query, mask, params, num_heads):
    """values/keys/query: (N, L, E); mask: (N, Q, K) or None."""
    N, v_len, E = values.shape
    k_len = keys.shape[1]
    q_len = query.shape[1]
    H = num_heads
    D = E // H
    assert D * H == E, "embed_size must be divisible by num_heads"
    assert v_len == k_len

    # Block-diagonal, pre-transposed projection weights: for x laid out
    # (tokens, E) = (tokens, H*D), x @ block_diag(W.T, ..., W.T) applies the
    # per-head nn.Linear(head_dim, head_dim, bias=False) to every head at once
    # and leaves the result in the same E-contiguous layout.
    def per_head_to_blockdiag(w):                 # w: (D, D) nn.Linear (out,in)
        return block_diag(*([w.T] * H))           # (E, E), (in, out) layout

    wq_b = per_head_to_blockdiag(params["wq"])
    wk_b = per_head_to_blockdiag(params["wk"])
    wv_b = per_head_to_blockdiag(params["wv"])
    wo_t = params["wo"].T                         # (E, E), (in, out)
    bo = params["bo"].reshape(1, E)

    tq = min(q_len, 128)                          # query tile (rows per step)
    grid = (N, pl.cdiv(q_len, tq))

    has_mask = mask is not None
    scale = 1.0 / (E ** 0.5)                      # module divides by sqrt(E)

    in_specs = [
        pl.BlockSpec((1, tq, E), lambda n, qi: (n, qi, 0)),     # query tile
        pl.BlockSpec((1, k_len, E), lambda n, qi: (n, 0, 0)),   # keys (full K)
        pl.BlockSpec((1, k_len, E), lambda n, qi: (n, 0, 0)),   # values
    ]
    operands = [query, keys, values]
    if has_mask:
        in_specs.append(
            pl.BlockSpec((1, tq, k_len), lambda n, qi: (n, qi, 0)))
        operands.append(
            (mask != 0).astype(jnp.int32).reshape(N, q_len, k_len))
    in_specs += [
        pl.BlockSpec((E, E), lambda n, qi: (0, 0)),             # wq (blockdiag)
        pl.BlockSpec((E, E), lambda n, qi: (0, 0)),             # wk
        pl.BlockSpec((E, E), lambda n, qi: (0, 0)),             # wv
        pl.BlockSpec((E, E), lambda n, qi: (0, 0)),             # wo^T
        pl.BlockSpec((1, E), lambda n, qi: (0, 0)),             # bias
    ]
    operands += [wq_b, wk_b, wv_b, wo_t, bo]

    kernel = partial(_mha_kernel, num_heads=H, head_dim=D,
                     scale=scale, has_mask=has_mask)

    return pl.pallas_call(
        kernel,
        out_shape=jax.ShapeDtypeStruct((N, q_len, E), jnp.float32),
        grid=grid,
        in_specs=in_specs,
        out_specs=pl.BlockSpec((1, tq, E), lambda n, qi: (n, qi, 0)),
        compiler_params=pltpu.CompilerParams(
            dimension_semantics=("parallel", "parallel")),
    )(*operands)


if __name__ == "__main__":
    embed_size, num_heads = 32, 4
    N, seq = 2, 8
    D = embed_size // num_heads

    key = jax.random.PRNGKey(0)
    ks = jax.random.split(key, 8)

    # Deterministic parameter init (nn.Linear-style uniform bounds).
    s_head = 1.0 / (D ** 0.5)
    s_out = 1.0 / (embed_size ** 0.5)
    params = {
        "wq": jax.random.uniform(ks[0], (D, D), jnp.float32, -s_head, s_head),
        "wk": jax.random.uniform(ks[1], (D, D), jnp.float32, -s_head, s_head),
        "wv": jax.random.uniform(ks[2], (D, D), jnp.float32, -s_head, s_head),
        "wo": jax.random.uniform(ks[3], (embed_size, embed_size),
                                 jnp.float32, -s_out, s_out),
        "bo": jax.random.uniform(ks[4], (embed_size,), jnp.float32,
                                 -s_out, s_out),
    }

    values = jax.random.normal(ks[5], (N, seq, embed_size), jnp.float32)
    keys_in = jax.random.normal(ks[6], (N, seq, embed_size), jnp.float32)
    query = jax.random.normal(ks[7], (N, seq, embed_size), jnp.float32)
    mask = jnp.broadcast_to(
        jnp.tril(jnp.ones((seq, seq), jnp.float32))[None], (N, seq, seq))

    # Pure-JAX reference mirroring the PyTorch forward exactly.
    def reference(values_a, keys_a, query_a, mask_a):
        v = values_a.reshape(N, seq, num_heads, D) @ params["wv"].T
        k = keys_a.reshape(N, seq, num_heads, D) @ params["wk"].T
        q = query_a.reshape(N, seq, num_heads, D) @ params["wq"].T
        energy = jnp.einsum("nqhd,nkhd->nhqk", q, k)
        if mask_a is not None:
            energy = jnp.where(mask_a[:, None] == 0,
                               jnp.float32(-1e20), energy)
        attn = jax.nn.softmax(energy / (embed_size ** 0.5), axis=3)
        o = jnp.einsum("nhql,nlhd->nqhd", attn, v).reshape(N, seq, embed_size)
        return o @ params["wo"].T + params["bo"]

    # Masked path.
    out = jax.block_until_ready(
        multi_head_attention(values, keys_in, query, mask, params, num_heads))
    expected = reference(values, keys_in, query, mask)
    assert out.shape == (N, seq, embed_size)
    assert jnp.allclose(out, expected, atol=2e-3, rtol=2e-3), \
        "mismatch vs reference (masked)"

    # mask=None path: no mask input is streamed and no where() is executed.
    out_nm = jax.block_until_ready(
        multi_head_attention(values, keys_in, query, None, params, num_heads))
    expected_nm = reference(values, keys_in, query, None)
    assert jnp.allclose(out_nm, expected_nm, atol=2e-3, rtol=2e-3), \
        "mismatch vs reference (no mask)"

    print("KERNEL_OK")
</pallas_src>

<mosaic_0001>
module attributes {stable_mosaic.version = 11 : i64} {
  func.func @_mha_kernel(%arg0: i32, %arg1: i32, %arg2: memref<1x8x32xf32, #tpu.memory_space<vmem>>, %arg3: memref<1x8x32xf32, #tpu.memory_space<vmem>>, %arg4: memref<1x8x32xf32, #tpu.memory_space<vmem>>, %arg5: memref<1x8x8xi32, #tpu.memory_space<vmem>>, %arg6: memref<32x32xf32, #tpu.memory_space<vmem>>, %arg7: memref<32x32xf32, #tpu.memory_space<vmem>>, %arg8: memref<32x32xf32, #tpu.memory_space<vmem>>, %arg9: memref<32x32xf32, #tpu.memory_space<vmem>>, %arg10: memref<1x32xf32, #tpu.memory_space<vmem>>, %arg11: memref<1x8x32xf32, #tpu.memory_space<vmem>>) attributes {dimension_semantics = [#tpu.dimension_semantics<parallel>, #tpu.dimension_semantics<parallel>], iteration_bounds = array<i64: 2, 1>, scalar_prefetch = 0 : i64, scratch_operands = 0 : i64, tpu.core_type = #tpu.core_type<tc>, window_params = [{transform_indices = @transform_0, window_bounds = array<i64: 1, 8, 32>}, {transform_indices = @transform_1, window_bounds = array<i64: 1, 8, 32>}, {transform_indices = @transform_2, window_bounds = array<i64: 1, 8, 32>}, {transform_indices = @transform_3, window_bounds = array<i64: 1, 8, 8>}, {pipeline_mode = #tpu.pipeline_mode<synchronous>, transform_indices = @transform_4, window_bounds = array<i64: 32, 32>}, {pipeline_mode = #tpu.pipeline_mode<synchronous>, transform_indices = @transform_5, window_bounds = array<i64: 32, 32>}, {pipeline_mode = #tpu.pipeline_mode<synchronous>, transform_indices = @transform_6, window_bounds = array<i64: 32, 32>}, {pipeline_mode = #tpu.pipeline_mode<synchronous>, transform_indices = @transform_7, window_bounds = array<i64: 32, 32>}, {pipeline_mode = #tpu.pipeline_mode<synchronous>, transform_indices = @transform_8, window_bounds = array<i64: 1, 32>}, {transform_indices = @transform_9, window_bounds = array<i64: 1, 8, 32>}]} {
    %c0 = arith.constant 0 : index
    %c0_0 = arith.constant 0 : index
    %c0_1 = arith.constant 0 : index
    %0 = vector.load %arg2[%c0, %c0_0, %c0_1] : memref<1x8x32xf32, #tpu.memory_space<vmem>>, vector<1x8x32xf32>
    %1 = vector.shape_cast %0 : vector<1x8x32xf32> to vector<8x32xf32>
    %c0_2 = arith.constant 0 : index
    %c0_3 = arith.constant 0 : index
    %c0_4 = arith.constant 0 : index
    %2 = vector.load %arg3[%c0_2, %c0_3, %c0_4] : memref<1x8x32xf32, #tpu.memory_space<vmem>>, vector<1x8x32xf32>
    %3 = vector.shape_cast %2 : vector<1x8x32xf32> to vector<8x32xf32>
    %c0_5 = arith.constant 0 : index
    %c0_6 = arith.constant 0 : index
    %c0_7 = arith.constant 0 : index
    %4 = vector.load %arg4[%c0_5, %c0_6, %c0_7] : memref<1x8x32xf32, #tpu.memory_space<vmem>>, vector<1x8x32xf32>
    %5 = vector.shape_cast %4 : vector<1x8x32xf32> to vector<8x32xf32>
    %c0_8 = arith.constant 0 : index
    %c0_9 = arith.constant 0 : index
    %6 = vector.load %arg6[%c0_8, %c0_9] : memref<32x32xf32, #tpu.memory_space<vmem>>, vector<32x32xf32>
    %cst = arith.constant dense<0.000000e+00> : vector<8x32xf32>
    %7 = tpu.matmul %1, %6, %cst {dimension_numbers = #tpu.dot_dimension_numbers<[1], [0], [0], [1], [0, 0, 1, 1], [], []>} : vector<8x32xf32>, vector<32x32xf32>, vector<8x32xf32> -> vector<8x32xf32>
    %cst_10 = arith.constant 0.176776692 : f32
    %8 = vector.broadcast %cst_10 : f32 to vector<8x32xf32>
    %9 = arith.mulf %7, %8 : vector<8x32xf32>
    %c0_11 = arith.constant 0 : index
    %c0_12 = arith.constant 0 : index
    %10 = vector.load %arg7[%c0_11, %c0_12] : memref<32x32xf32, #tpu.memory_space<vmem>>, vector<32x32xf32>
    %cst_13 = arith.constant dense<0.000000e+00> : vector<8x32xf32>
    %11 = tpu.matmul %3, %10, %cst_13 {dimension_numbers = #tpu.dot_dimension_numbers<[1], [0], [0], [1], [0, 0, 1, 1], [], []>} : vector<8x32xf32>, vector<32x32xf32>, vector<8x32xf32> -> vector<8x32xf32>
    %c0_14 = arith.constant 0 : index
    %c0_15 = arith.constant 0 : index
    %12 = vector.load %arg8[%c0_14, %c0_15] : memref<32x32xf32, #tpu.memory_space<vmem>>, vector<32x32xf32>
    %cst_16 = arith.constant dense<0.000000e+00> : vector<8x32xf32>
    %13 = tpu.matmul %5, %12, %cst_16 {dimension_numbers = #tpu.dot_dimension_numbers<[1], [0], [0], [1], [0, 0, 1, 1], [], []>} : vector<8x32xf32>, vector<32x32xf32>, vector<8x32xf32> -> vector<8x32xf32>
    %c0_17 = arith.constant 0 : index
    %c0_18 = arith.constant 0 : index
    %c0_19 = arith.constant 0 : index
    %14 = vector.load %arg5[%c0_17, %c0_18, %c0_19] : memref<1x8x8xi32, #tpu.memory_space<vmem>>, vector<1x8x8xi32>
    %15 = vector.shape_cast %14 : vector<1x8x8xi32> to vector<8x8xi32>
    %c0_i32 = arith.constant 0 : i32
    %16 = vector.broadcast %c0_i32 : i32 to vector<8x8xi32>
    %17 = arith.cmpi ne, %15, %16 : vector<8x8xi32>
    %18 = vector.extract_strided_slice %9 {offsets = [0, 0], sizes = [8, 8], strides = [1, 1]} : vector<8x32xf32> to vector<8x8xf32>
    %19 = vector.extract_strided_slice %11 {offsets = [0, 0], sizes = [8, 8], strides = [1, 1]} : vector<8x32xf32> to vector<8x8xf32>
    %20 = vector.extract_strided_slice %13 {offsets = [0, 0], sizes = [8, 8], strides = [1, 1]} : vector<8x32xf32> to vector<8x8xf32>
    %cst_20 = arith.constant dense<0.000000e+00> : vector<8x8xf32>
    %21 = tpu.matmul %18, %19, %cst_20 {dimension_numbers = #tpu.dot_dimension_numbers<[1], [1], [0], [0], [0, 0, 1, 0], [], []>} : vector<8x8xf32>, vector<8x8xf32>, vector<8x8xf32> -> vector<8x8xf32>
    %cst_21 = arith.constant -1.000000e+20 : f32
    %22 = vector.broadcast %cst_21 : f32 to vector<8x8xf32>
    %23 = arith.select %17, %21, %22 : vector<8x8xi1>, vector<8x8xf32>
    %cst_22 = arith.constant dense<0xFF800000> : vector<8xf32>
    %24 = vector.multi_reduction <maximumf>, %23, %cst_22 [1] : vector<8x8xf32> to vector<8xf32>
    %25 = vector.shape_cast %24 : vector<8xf32> to vector<8x1xf32>
    %26 = vector.broadcast %25 : vector<8x1xf32> to vector<8x8xf32>
    %27 = arith.subf %23, %26 : vector<8x8xf32>
    %28 = math.exp %27 : vector<8x8xf32>
    %cst_23 = arith.constant dense<0.000000e+00> : vector<8xf32>
    %29 = vector.multi_reduction <add>, %28, %cst_23 [1] : vector<8x8xf32> to vector<8xf32>
    %30 = vector.shape_cast %29 : vector<8xf32> to vector<8x1xf32>
    %31 = tpu.reciprocal %30 {approx = true} : vector<8x1xf32> -> vector<8x1xf32>
    %32 = vector.broadcast %31 : vector<8x1xf32> to vector<8x8xf32>
    %33 = arith.mulf %28, %32 : vector<8x8xf32>
    %cst_24 = arith.constant dense<0.000000e+00> : vector<8x8xf32>
    %34 = tpu.matmul %33, %20, %cst_24 {dimension_numbers = #tpu.dot_dimension_numbers<[1], [0], [0], [1], [0, 0, 1, 1], [], []>} : vector<8x8xf32>, vector<8x8xf32>, vector<8x8xf32> -> vector<8x8xf32>
    %35 = vector.extract_strided_slice %9 {offsets = [0, 8], sizes = [8, 8], strides = [1, 1]} : vector<8x32xf32> to vector<8x8xf32>
    %36 = vector.extract_strided_slice %11 {offsets = [0, 8], sizes = [8, 8], strides = [1, 1]} : vector<8x32xf32> to vector<8x8xf32>
    %37 = vector.extract_strided_slice %13 {offsets = [0, 8], sizes = [8, 8], strides = [1, 1]} : vector<8x32xf32> to vector<8x8xf32>
    %cst_25 = arith.constant dense<0.000000e+00> : vector<8x8xf32>
    %38 = tpu.matmul %35, %36, %cst_25 {dimension_numbers = #tpu.dot_dimension_numbers<[1], [1], [0], [0], [0, 0, 1, 0], [], []>} : vector<8x8xf32>, vector<8x8xf32>, vector<8x8xf32> -> vector<8x8xf32>
    %cst_26 = arith.constant -1.000000e+20 : f32
    %39 = vector.broadcast %cst_26 : f32 to vector<8x8xf32>
    %40 = arith.select %17, %38, %39 : vector<8x8xi1>, vector<8x8xf32>
    %cst_27 = arith.constant dense<0xFF800000> : vector<8xf32>
    %41 = vector.multi_reduction <maximumf>, %40, %cst_27 [1] : vector<8x8xf32> to vector<8xf32>
    %42 = vector.shape_cast %41 : vector<8xf32> to vector<8x1xf32>
    %43 = vector.broadcast %42 : vector<8x1xf32> to vector<8x8xf32>
    %44 = arith.subf %40, %43 : vector<8x8xf32>
    %45 = math.exp %44 : vector<8x8xf32>
    %cst_28 = arith.constant dense<0.000000e+00> : vector<8xf32>
    %46 = vector.multi_reduction <add>, %45, %cst_28 [1] : vector<8x8xf32> to vector<8xf32>
    %47 = vector.shape_cast %46 : vector<8xf32> to vector<8x1xf32>
    %48 = tpu.reciprocal %47 {approx = true} : vector<8x1xf32> -> vector<8x1xf32>
    %49 = vector.broadcast %48 : vector<8x1xf32> to vector<8x8xf32>
    %50 = arith.mulf %45, %49 : vector<8x8xf32>
    %cst_29 = arith.constant dense<0.000000e+00> : vector<8x8xf32>
    %51 = tpu.matmul %50, %37, %cst_29 {dimension_numbers = #tpu.dot_dimension_numbers<[1], [0], [0], [1], [0, 0, 1, 1], [], []>} : vector<8x8xf32>, vector<8x8xf32>, vector<8x8xf32> -> vector<8x8xf32>
    %52 = vector.extract_strided_slice %9 {offsets = [0, 16], sizes = [8, 8], strides = [1, 1]} : vector<8x32xf32> to vector<8x8xf32>
    %53 = vector.extract_strided_slice %11 {offsets = [0, 16], sizes = [8, 8], strides = [1, 1]} : vector<8x32xf32> to vector<8x8xf32>
    %54 = vector.extract_strided_slice %13 {offsets = [0, 16], sizes = [8, 8], strides = [1, 1]} : vector<8x32xf32> to vector<8x8xf32>
    %cst_30 = arith.constant dense<0.000000e+00> : vector<8x8xf32>
    %55 = tpu.matmul %52, %53, %cst_30 {dimension_numbers = #tpu.dot_dimension_numbers<[1], [1], [0], [0], [0, 0, 1, 0], [], []>} : vector<8x8xf32>, vector<8x8xf32>, vector<8x8xf32> -> vector<8x8xf32>
    %cst_31 = arith.constant -1.000000e+20 : f32
    %56 = vector.broadcast %cst_31 : f32 to vector<8x8xf32>
    %57 = arith.select %17, %55, %56 : vector<8x8xi1>, vector<8x8xf32>
    %cst_32 = arith.constant dense<0xFF800000> : vector<8xf32>
    %58 = vector.multi_reduction <maximumf>, %57, %cst_32 [1] : vector<8x8xf32> to vector<8xf32>
    %59 = vector.shape_cast %58 : vector<8xf32> to vector<8x1xf32>
    %60 = vector.broadcast %59 : vector<8x1xf32> to vector<8x8xf32>
    %61 = arith.subf %57, %60 : vector<8x8xf32>
    %62 = math.exp %61 : vector<8x8xf32>
    %cst_33 = arith.constant dense<0.000000e+00> : vector<8xf32>
    %63 = vector.multi_reduction <add>, %62, %cst_33 [1] : vector<8x8xf32> to vector<8xf32>
    %64 = vector.shape_cast %63 : vector<8xf32> to vector<8x1xf32>
    %65 = tpu.reciprocal %64 {approx = true} : vector<8x1xf32> -> vector<8x1xf32>
    %66 = vector.broadcast %65 : vector<8x1xf32> to vector<8x8xf32>
    %67 = arith.mulf %62, %66 : vector<8x8xf32>
    %cst_34 = arith.constant dense<0.000000e+00> : vector<8x8xf32>
    %68 = tpu.matmul %67, %54, %cst_34 {dimension_numbers = #tpu.dot_dimension_numbers<[1], [0], [0], [1], [0, 0, 1, 1], [], []>} : vector<8x8xf32>, vector<8x8xf32>, vector<8x8xf32> -> vector<8x8xf32>
    %69 = vector.extract_strided_slice %9 {offsets = [0, 24], sizes = [8, 8], strides = [1, 1]} : vector<8x32xf32> to vector<8x8xf32>
    %70 = vector.extract_strided_slice %11 {offsets = [0, 24], sizes = [8, 8], strides = [1, 1]} : vector<8x32xf32> to vector<8x8xf32>
    %71 = vector.extract_strided_slice %13 {offsets = [0, 24], sizes = [8, 8], strides = [1, 1]} : vector<8x32xf32> to vector<8x8xf32>
    %cst_35 = arith.constant dense<0.000000e+00> : vector<8x8xf32>
    %72 = tpu.matmul %69, %70, %cst_35 {dimension_numbers = #tpu.dot_dimension_numbers<[1], [1], [0], [0], [0, 0, 1, 0], [], []>} : vector<8x8xf32>, vector<8x8xf32>, vector<8x8xf32> -> vector<8x8xf32>
    %cst_36 = arith.constant -1.000000e+20 : f32
    %73 = vector.broadcast %cst_36 : f32 to vector<8x8xf32>
    %74 = arith.select %17, %72, %73 : vector<8x8xi1>, vector<8x8xf32>
    %cst_37 = arith.constant dense<0xFF800000> : vector<8xf32>
    %75 = vector.multi_reduction <maximumf>, %74, %cst_37 [1] : vector<8x8xf32> to vector<8xf32>
    %76 = vector.shape_cast %75 : vector<8xf32> to vector<8x1xf32>
    %77 = vector.broadcast %76 : vector<8x1xf32> to vector<8x8xf32>
    %78 = arith.subf %74, %77 : vector<8x8xf32>
    %79 = math.exp %78 : vector<8x8xf32>
    %cst_38 = arith.constant dense<0.000000e+00> : vector<8xf32>
    %80 = vector.multi_reduction <add>, %79, %cst_38 [1] : vector<8x8xf32> to vector<8xf32>
    %81 = vector.shape_cast %80 : vector<8xf32> to vector<8x1xf32>
    %82 = tpu.reciprocal %81 {approx = true} : vector<8x1xf32> -> vector<8x1xf32>
    %83 = vector.broadcast %82 : vector<8x1xf32> to vector<8x8xf32>
    %84 = arith.mulf %79, %83 : vector<8x8xf32>
    %cst_39 = arith.constant dense<0.000000e+00> : vector<8x8xf32>
    %85 = tpu.matmul %84, %71, %cst_39 {dimension_numbers = #tpu.dot_dimension_numbers<[1], [0], [0], [1], [0, 0, 1, 1], [], []>} : vector<8x8xf32>, vector<8x8xf32>, vector<8x8xf32> -> vector<8x8xf32>
    %86 = tpu.concatenate %34, %51, %68, %85 in 1 : vector<8x8xf32>, vector<8x8xf32>, vector<8x8xf32>, vector<8x8xf32> -> vector<8x32xf32>
    %c0_40 = arith.constant 0 : index
    %c0_41 = arith.constant 0 : index
    %87 = vector.load %arg9[%c0_40, %c0_41] : memref<32x32xf32, #tpu.memory_space<vmem>>, vector<32x32xf32>
    %cst_42 = arith.constant dense<0.000000e+00> : vector<8x32xf32>
    %88 = tpu.matmul %86, %87, %cst_42 {dimension_numbers = #tpu.dot_dimension_numbers<[1], [0], [0], [1], [0, 0, 1, 1], [], []>} : vector<8x32xf32>, vector<32x32xf32>, vector<8x32xf32> -> vector<8x32xf32>
    %c0_43 = arith.constant 0 : index
    %c0_44 = arith.constant 0 : index
    %89 = vector.load %arg10[%c0_43, %c0_44] : memref<1x32xf32, #tpu.memory_space<vmem>>, vector<1x32xf32>
    %90 = vector.broadcast %89 : vector<1x32xf32> to vector<8x32xf32>
    %91 = arith.addf %88, %90 : vector<8x32xf32>
    %92 = vector.shape_cast %91 : vector<8x32xf32> to vector<1x8x32xf32>
    %c0_45 = arith.constant 0 : index
    %c0_46 = arith.constant 0 : index
    %c0_47 = arith.constant 0 : index
    %93 = vector.load %arg11[%c0_45, %c0_46, %c0_47] : memref<1x8x32xf32, #tpu.memory_space<vmem>>, vector<1x8x32xf32>
    tpu.vector_store %arg11[%c0_45, %c0_46, %c0_47], %92 {strides = array<i32>} : memref<1x8x32xf32, #tpu.memory_space<vmem>>, vector<1x8x32xf32>,
    return
  }
  func.func @transform_0(%arg0: i32, %arg1: i32) -> (i32, i32, i32) {
    %c0_i32 = arith.constant 0 : i32
    %c0_i32_0 = arith.constant 0 : i32
    return %arg0, %arg1, %c0_i32 : i32, i32, i32
  }
  func.func @transform_1(%arg0: i32, %arg1: i32) -> (i32, i32, i32) {
    %c0_i32 = arith.constant 0 : i32
    %c0_i32_0 = arith.constant 0 : i32
    %c0_i32_1 = arith.constant 0 : i32
    return %arg0, %c0_i32, %c0_i32_0 : i32, i32, i32
  }
  func.func @transform_2(%arg0: i32, %arg1: i32) -> (i32, i32, i32) {
    %c0_i32 = arith.constant 0 : i32
    %c0_i32_0 = arith.constant 0 : i32
    %c0_i32_1 = arith.constant 0 : i32
    return %arg0, %c0_i32, %c0_i32_0 : i32, i32, i32
  }
  func.func @transform_3(%arg0: i32, %arg1: i32) -> (i32, i32, i32) {
    %c0_i32 = arith.constant 0 : i32
    %c0_i32_0 = arith.constant 0 : i32
    return %arg0, %arg1, %c0_i32 : i32, i32, i32
  }
  func.func @transform_4(%arg0: i32, %arg1: i32) -> (i32, i32) {
    %c0_i32 = arith.constant 0 : i32
    %c0_i32_0 = arith.constant 0 : i32
    %c0_i32_1 = arith.constant 0 : i32
    return %c0_i32, %c0_i32_0 : i32, i32
  }
  func.func @transform_5(%arg0: i32, %arg1: i32) -> (i32, i32) {
    %c0_i32 = arith.constant 0 : i32
    %c0_i32_0 = arith.constant 0 : i32
    %c0_i32_1 = arith.constant 0 : i32
    return %c0_i32, %c0_i32_0 : i32, i32
  }
  func.func @transform_6(%arg0: i32, %arg1: i32) -> (i32, i32) {
    %c0_i32 = arith.constant 0 : i32
    %c0_i32_0 = arith.constant 0 : i32
    %c0_i32_1 = arith.constant 0 : i32
    return %c0_i32, %c0_i32_0 : i32, i32
  }
  func.func @transform_7(%arg0: i32, %arg1: i32) -> (i32, i32) {
    %c0_i32 = arith.constant 0 : i32
    %c0_i32_0 = arith.constant 0 : i32
    %c0_i32_1 = arith.constant 0 : i32
    return %c0_i32, %c0_i32_0 : i32, i32
  }
  func.func @transform_8(%arg0: i32, %arg1: i32) -> (i32, i32) {
    %c0_i32 = arith.constant 0 : i32
    %c0_i32_0 = arith.constant 0 : i32
    %c0_i32_1 = arith.constant 0 : i32
    return %c0_i32, %c0_i32_0 : i32, i32
  }
  func.func @transform_9(%arg0: i32, %arg1: i32) -> (i32, i32, i32) {
    %c0_i32 = arith.constant 0 : i32
    %c0_i32_0 = arith.constant 0 : i32
    return %arg0, %arg1, %c0_i32 : i32, i32, i32
  }
}

</mosaic_0001>

<bundles_post_ra>
// kernel: tpu_custom_call.1
= control target key start
LH: loop header
LB: loop body
LE: loop exit
PB: predicated region body
PF: predicated region fallthrough
CT: control target
= control target key end

     0   :  { %s2992_s0 = inlined_call_operand.hbm [shape: f32[2,8,32], index: 0, kind: input, shape index: {}]   ;;  %s2993_s1 = inlined_call_operand.hbm [shape: f32[2,8,32], index: 1, kind: input, shape index: {}]   ;;  %s2994_s2 = inlined_call_operand.hbm [shape: f32[2,8,32], index: 2, kind: input, shape index: {}]   ;;  %s2995_s3 = inlined_call_operand.hbm [shape: s32[2,8,8], index: 3, kind: input, shape index: {}]   ;;  %s2996_s4 = inlined_call_operand.hbm [shape: f32[32,32], index: 4, kind: input, shape index: {}]   ;;  %s2997_s5 = inlined_call_operand.hbm [shape: f32[32,32], index: 5, kind: input, shape index: {}]   ;;  %s2998_s6 = inlined_call_operand.hbm [shape: f32[32,32], index: 6, kind: input, shape index: {}]   ;;  %s2999_s7 = inlined_call_operand.hbm [shape: f32[32,32], index: 7, kind: input, shape index: {}]   ;;  %s3000_s8 = inlined_call_operand.vmem [shape: f32[1,32], index: 8, kind: input, shape index: {}]   ;;  %s3001_s9 = inlined_call_operand.hbm [shape: f32[2,8,32], index: 9, kind: output, shape index: {}]  }
   0x1   :  { %3025 = sst [smem:[#allocation31_spill]] %s2993_s1 }
   0x2   :  { %3026 = sst [smem:[#allocation32_spill]] %s2996_s4 }
   0x3   :  { %3027 = sst [smem:[#allocation33_spill]] %s2997_s5 }
   0x4   :  { %3028 = sst [smem:[#allocation34_spill]] %s3000_s8 }
   0x5   :  { %3029 = sst [smem:[#allocation35_spill]] %s3001_s9 }
   0x6   :  { %14 = vsyncpa [#allocation3], 0 }
   0x7   :  { %16 = vsyncpa [#allocation3 + $0x1], 0 }
   0x8   :  { %17 = vsyncpa [#allocation6], 0 }
   0x9   :  { %19 = vsyncpa [#allocation6 + $0x1], 0 }
   0xa   :  { %20 = vsyncpa [#allocation9], 0 }
   0xb   :  { %22 = vsyncpa [#allocation9 + $0x1], 0 }
   0xc   :  { %23 = vsyncpa [#allocation12], 0 }
   0xd   :  { %24 = vsyncpa [#allocation15], 0 }
   0xe   :  { %25 = vsyncpa [#allocation4], 0 }
   0xf   :  { %27 = vsyncpa [#allocation4 + $0x1], 0  ;;  %s2477_s30 = smov 0   ;;  %s2479_s10 = smov 0  }
  0x10   :  { %s2481_s11 = smov 0   ;;  %s2483_s12 = smov 0  }
  0x11   :  { %s2485_s13 = smov 0   ;;  %s2487_s14 = smov 0  }
  0x12 LB: > { %3030 = sst [smem:[#allocation24_spill]] %s2385_s30  ;;  %s2508_s15 = sadd.s32 4294967295, %s2405_s14   ;;  %s2405_s14 = sphi %s2487_s14, %s33_s14   ;;  %s2401_s13 = sphi %s2485_s13, %s3077_s13   ;;  %s2397_s12 = sphi %s2483_s12, %s3076_s12   ;;  %s2393_s11 = sphi %s2481_s11, %s3080_s11   ;;  %s2389_s10 = sphi %s2479_s10, %s3079_s10   ;;  %s2385_s30 = sphi %s2477_s30, %s3078_s30  }
  0x13   : > { %3031 = sst [smem:[#allocation25_spill]] %s2397_s12  ;;  %s1736_s16 = sadd.s32 4294967294, %s2405_s14  }
  0x14   : > { %3032 = sst [smem:[#allocation26_spill]] %s2401_s13  ;;  %p67_p0 = scmp.ne.s32.totalorder %s2389_s10, %s2385_s30 }
  0x15   : > { %p3002_p1 = scmp.eq.s32.totalorder %s2508_s15, 0  ;;  %p284_p3 = scmp.eq.s32.totalorder %s1736_s16, 1 }
  0x16   : > { %p1737_p5 = scmp.ge.s32.totalorder %s2405_s14, 1  ;;  %p291_p7 = scmp.lt.s32.totalorder %s2405_s14, 3 }
  0x17   : > { %p2517_p4 = por %p3002_p1, %p67_p0  ;;  %p2522_p6 = por %p284_p3, %p67_p0 }
  0x18   : > { %p2527_p8 = pnand %p1737_p5, %p291_p7  ;;  %s2407_s20 = smov [#allocation10]  }
  0x19   : > { %s3033_s17 = scalar_select %p2517_p4, 1, 0 }
  0x1a   : > { %s3034_s18 = scalar_select %p2522_p6, 1, 0 }
  0x1b   : > { %s3036_s19 = scalar_select %p2527_p8, 1, 0 }
  0x1c   : > { %3035 = sst [smem:[#allocation27_spill]] %s3034_s18  ;;  %s303_s21 = sshll.u32 %s2407_s20, 4  ;;  %s2531_s21 = int_to_ptr.vmem [resolvable:$true] %s303_s21 }
  0x1d   : > { %p1952_p9 = pneg %p2527_p8  ;;  %s2408_s23 = smov [#allocation11]  }
  0x1e   : > { %s316_s24 = sshll.u32 %s2408_s23, 4  ;;  %s3038_s4 = sld [smem:[#allocation32_spill]]  ;;  %s2542_s24 = int_to_ptr.vmem [resolvable:$true] %s316_s24 }
  0x1f   : > { %p2538_p11 = pnand %p1952_p9, %p3002_p1 }
  0x21   : > { %s3037_s22 = scalar_select %p2538_p11, 1, 0 }
  0x22   : > { %p2552_p13 = pneg %p2538_p11 }
  0x24   : > { %s2071_s27 = scalar_lea.hbm %s3038_s4, 512 }
  0x25   : > { %p2072_p12 = scmp.ne.s32.totalorder %s3038_s4, %s2071_s27  ;;  %p2078_p5 = scmp.lt.u32.totalorder %s2071_s27, %s3038_s4 }
  0x26   : > { %s3039_s16 = scalar_select %p2552_p13, 1, 0 }
  0x27   : > { %p2074_p0 = pnand %p2552_p13, %p2072_p12 }
  0x29   : > { %p2075_p3 = pneg %p2074_p0 }
  0x2b   : > { %p2080_p7 = pnand %p2078_p5, %p2075_p3 }
  0x2d   : > { %2083 = shalt.err (!%p2080_p7)
}
  0x2e   : > { %s2084_s25 = scalar_lea.vmem %s2531_s21, 512  ;;  %p2092_p2 = scmp.lt.s32.totalorder %s2531_s21, %s2531_s21 }
  0x2f   : > { %p2085_p9 = scmp.ne.s32.totalorder %s2531_s21, %s2084_s25  ;;  %p2093_p6 = scmp.lt.s32.totalorder %s2084_s25, %s2084_s25 }
  0x31   : > { %p2087_p10 = pnand %p2085_p9, %p2552_p13  ;;  %p2094_p12 = por %p2093_p6, %p2092_p2 }
  0x33   : > { %p2088_p1 = pneg %p2087_p10 }
  0x35   : > { %p2095_p0 = pnand %p2094_p12, %p2088_p1 }
  0x37   : > { %2098 = shalt.err (!%p2095_p0)
}
  0x38   : > { %s3006_s26 = smov 128   ;;  %s3008_s27 = smov 8  }
  0x39   : > { %1955 = dma.hbm_to_vmem [thread:$0]  (!%p2538_p11), %s3038_s4, 512, %s2531_s21, [#allocation9], %s3006_s26, %s3006_s26, %s3008_s27  }
  0x3a   : > { %s3040_s5 = sld [smem:[#allocation33_spill]] }
  0x40   : > { %s2099_s25 = scalar_lea.hbm %s3040_s5, 512 }
  0x41   : > { %p2100_p1 = scmp.ne.s32.totalorder %s3040_s5, %s2099_s25  ;;  %p2106_p10 = scmp.lt.u32.totalorder %s2099_s25, %s3040_s5 }
  0x43   : > { %p2102_p2 = pnand %p2100_p1, %p2552_p13 }
  0x45   : > { %p2103_p6 = pneg %p2102_p2 }
  0x47   : > { %p2108_p3 = pnand %p2106_p10, %p2103_p6 }
  0x49   : > { %2111 = shalt.err (!%p2108_p3)
}
  0x4a   : > { %s2112_s21 = scalar_lea.vmem %s2542_s24, 512  ;;  %p2120_p12 = scmp.lt.s32.totalorder %s2542_s24, %s2542_s24 }
  0x4b   : > { %p2113_p5 = scmp.ne.s32.totalorder %s2542_s24, %s2112_s21  ;;  %p2121_p0 = scmp.lt.s32.totalorder %s2112_s21, %s2112_s21 }
  0x4d   : > { %p2115_p7 = pnand %p2113_p5, %p2552_p13  ;;  %p2122_p1 = por %p2121_p0, %p2120_p12 }
  0x4f   : > { %p2116_p9 = pneg %p2115_p7 }
  0x51   : > { %p2123_p2 = pnand %p2122_p1, %p2116_p9 }
  0x53   : > { %2126 = shalt.err (!%p2123_p2)
}
  0x54   : > { %1958 = dma.hbm_to_vmem [thread:$0]  (!%p2538_p11), %s3040_s5, 512, %s2542_s24, [#allocation12], %s3006_s26, %s3006_s26, %s3008_s27  }
  0x55   : > { %s45_s30 = sadd.s32 1, %s2401_s13  ;;  %s54_s18 = sadd.s32 1, %s2393_s11 }
  0x56   : > { %p47_p6 = scmp.ge.s32.totalorder %s45_s30, 2  ;;  %p61_p10 = scmp.ne.s32.totalorder %s2393_s11, %s2389_s10 }
  0x57   : > { %p62_p3 = scmp.eq.s32.totalorder %s2405_s14, 0  ;;  %p1986_p5 = scmp.lt.s32.totalorder %s2405_s14, 2 }
  0x58   : > { %s3082_s30 = smov (%p47_p6, %s45_s30), 0  ;;  %p3042_p9 = scmp.eq.s32.totalorder %s2508_s15, 1 }
  0x59   : > { %3041 = sst [smem:[#allocation28_spill]] %s3082_s30  ;;  %p63_p7 = por %p62_p3, %p61_p10 }
  0x5a   : > { %p2612_p12 = por %p3042_p9, %p61_p10  ;;  %s49_s29 = ssub.s32 %s2401_s13, %s3082_s30 }
  0x5b   : > { %s3010_s24 = sand.u32 1, %s2393_s11   ;;  %p52_p0 = scmp.eq.s32.totalorder %s49_s29, 0 }
  0x5c   : > { %s3043_s28 = scalar_select %p2612_p12, 1, 0 }
  0x5d   : > { %s2621_s20 = sshll.u32 %s3010_s24, 3  ;;  %s2624_s23 = sshll.u32 %s2401_s13, 7 }
  0x5e   : > { %3044 = sst [smem:[#allocation29_spill]] %s3043_s28  ;;  %p2626_p1 = pnand %p1986_p5, %p63_p7 }
  0x5f   : > { %s2631_s21 = scalar_select %p52_p0, %s2393_s11, %s54_s18  }
  0x60   : > { %s3045_s25 = scalar_select %p2626_p1, 1, 0 }
  0x61   : > { %3046 = sst [smem:[#allocation30_spill]] %s2631_s21  ;;  %s3015_s8 = sand.u32 1, %s2405_s14  }
  0x62   : > { %s3047_s1 = sld [smem:[#allocation31_spill]]  ;;  %s382_s29 = scalar_lea.vmem [#allocation5], %s2621_s20 }
  0x63   : > { %s389_s24 = sshll.u32 %s382_s29, 4  ;;  %s2645_s4 = scalar_lea.sflag [#allocation6], %s3015_s8  ;;  %s2641_s24 = int_to_ptr.vmem [resolvable:$true] %s389_s24 }
  0x64   : > { %p2651_p6 = pneg %p2626_p1 }
  0x68   : > { %s2638_s27 = scalar_lea.hbm %s3047_s1, %s2624_s23  ;;  %s2132_s29 = scalar_lea.hbm %s3047_s1, 256 }
  0x69   : > { %s2127_s5 = scalar_lea.hbm %s2638_s27, 128  ;;  %p2133_p5 = scmp.lt.u32.totalorder %s2638_s27, %s3047_s1 }
  0x6a   : > { %p2128_p2 = scmp.ne.s32.totalorder %s2638_s27, %s2127_s5  ;;  %p2134_p7 = scmp.lt.u32.totalorder %s2132_s29, %s2127_s5 }
  0x6b   : > { %p2136_p0 = scmp.lt.u32.totalorder %s2127_s5, %s2638_s27 }
  0x6c   : > { %p2130_p10 = pnand %p2651_p6, %p2128_p2  ;;  %p2135_p9 = por %p2134_p7, %p2133_p5 }
  0x6e   : > { %p2131_p3 = pneg %p2130_p10  ;;  %p2137_p12 = por %p2136_p0, %p2135_p9 }
  0x70   : > { %p2138_p4 = pnand %p2137_p12, %p2131_p3 }
  0x72   : > { %2141 = shalt.err (!%p2138_p4)
}
  0x73   : > { %s2142_s8 = scalar_lea.vmem %s2641_s24, 128  ;;  %s2411_s26 = smov [#allocation5]  }
  0x74   : > { %p2143_p2 = scmp.ne.s32.totalorder %s2641_s24, %s2142_s8  ;;  %s2147_s9 = sshll.u32 %s2411_s26, 4  ;;  %s2148_s9 = int_to_ptr.vmem [resolvable:$false] %s2147_s9 }
  0x75   : > { %s2149_s13 = scalar_lea.vmem %s2148_s9, 256  ;;  %p2150_p11 = scmp.lt.s32.totalorder %s2641_s24, %s2148_s9 }
  0x76   : > { %p2145_p10 = pnand %p2143_p2, %p2651_p6  ;;  %p2151_p13 = scmp.lt.s32.totalorder %s2149_s13, %s2142_s8 }
  0x78   : > { %p2146_p8 = pneg %p2145_p10  ;;  %p2152_p5 = por %p2151_p13, %p2150_p11 }
  0x7a   : > { %p2153_p7 = pnand %p2152_p5, %p2146_p8 }
  0x7c   : > { %2156 = shalt.err (!%p2153_p7)
}
  0x7d   : > { %1971 = dma.hbm_to_vmem [thread:$0]  (!%p2626_p1), %s2638_s27, 128, %s2641_s24, %s2645_s4  }
  0x7e   : > { %s2412_s5 = smov [#allocation13]   ;;  %s2413_s29 = smov [#allocation14]  }
  0x7f   : > { %s329_s30 = sshll.u32 %s2412_s5, 4  ;;  %s342_s1 = sshll.u32 %s2413_s29, 4  ;;  %s330_s30 = int_to_ptr.vmem [resolvable:$true] %s329_s30  ;;  %s2675_s1 = int_to_ptr.vmem [resolvable:$true] %s342_s1 }
  0x80   : > { %s2157_s8 = scalar_lea.hbm %s2998_s6, 512  ;;  %p3049_p8 = scmp.ne.s32.totalorder %s3039_s16, 0 }
  0x81   : > { %p2158_p4 = scmp.ne.s32.totalorder %s2998_s6, %s2157_s8  ;;  %p2164_p12 = scmp.lt.u32.totalorder %s2157_s8, %s2998_s6 }
  0x83   : > { %p2160_p11 = pnand %p2158_p4, %p3049_p8 }
  0x85   : > { %p2161_p13 = pneg %p2160_p11 }
  0x87   : > { %p2166_p3 = pnand %p2164_p12, %p2161_p13 }
  0x89   : > { %2169 = shalt.err (!%p2166_p3)
}
  0x8a   : > { %s2170_s24 = scalar_lea.vmem %s330_s30, 512  ;;  %p2178_p10 = scmp.lt.s32.totalorder %s330_s30, %s330_s30 }
  0x8b   : > { %p2171_p9 = scmp.ne.s32.totalorder %s330_s30, %s2170_s24  ;;  %p2179_p5 = scmp.lt.s32.totalorder %s2170_s24, %s2170_s24 }
  0x8d   : > { %p2173_p0 = pnand %p2171_p9, %p3049_p8  ;;  %p2180_p7 = por %p2179_p5, %p2178_p10 }
  0x8f   : > { %p2174_p2 = pneg %p2173_p0 }
  0x91   : > { %p2181_p1 = pnand %p2180_p7, %p2174_p2 }
  0x93   : > { %2184 = shalt.err (!%p2181_p1)
}
  0x94   : > { %p3050_p4 = scmp.ne.s32.totalorder %s3037_s22, 0  ;;  %s3051_s21 = smov 8  }
  0x95   : > { %s3052_s5 = smov 128   ;;  %s2185_s8 = scalar_lea.hbm %s2999_s7, 512 }
  0x96   : > { %1961 = dma.hbm_to_vmem [thread:$0]  (!%p3050_p4), %s2998_s6, 512, %s330_s30, [#allocation12], %s3052_s5, %s3052_s5, %s3051_s21  }
  0x97   : > { %p2186_p11 = scmp.ne.s32.totalorder %s2999_s7, %s2185_s8  ;;  %p2192_p12 = scmp.lt.u32.totalorder %s2185_s8, %s2999_s7 }
  0x99   : > { %p2188_p1 = pnand %p2186_p11, %p3049_p8 }
  0x9b   : > { %p2189_p13 = pneg %p2188_p1 }
  0x9d   : > { %p2194_p3 = pnand %p2192_p12, %p2189_p13 }
  0x9f   : > { %2197 = shalt.err (!%p2194_p3)
}
  0xa0   : > { %s2198_s30 = scalar_lea.vmem %s2675_s1, 512  ;;  %p2206_p10 = scmp.lt.s32.totalorder %s2675_s1, %s2675_s1 }
  0xa1   : > { %p2199_p9 = scmp.ne.s32.totalorder %s2675_s1, %s2198_s30  ;;  %p2207_p5 = scmp.lt.s32.totalorder %s2198_s30, %s2198_s30 }
  0xa3   : > { %p2201_p0 = pnand %p2199_p9, %p3049_p8  ;;  %p2208_p7 = por %p2207_p5, %p2206_p10 }
  0xa5   : > { %p2202_p2 = pneg %p2201_p0 }
  0xa7   : > { %p2209_p11 = pnand %p2208_p7, %p2202_p2 }
  0xa9   : > { %2212 = shalt.err (!%p2209_p11)
}
  0xaa   : > { %1964 = dma.hbm_to_vmem [thread:$0]  (!%p3050_p4), %s2999_s7, 512, %s2675_s1, [#allocation15], %s3052_s5, %s3052_s5, %s3051_s21  }
  0xab   : > { %s2728_s26 = scalar_lea.hbm %s2992_s0, %s2624_s23  ;;  %s363_s22 = scalar_lea.vmem [#allocation2], %s2621_s20 }
  0xac   : > { %s371_s9 = sshll.u32 %s363_s22, 4  ;;  %s3053_s8 = sand.u32 1, %s2393_s11   ;;  %s372_s9 = int_to_ptr.vmem [resolvable:$true] %s371_s9 }
  0xad   : > { %s360_s13 = scalar_lea.sflag [#allocation3], %s3053_s8  ;;  %s2213_s27 = scalar_lea.hbm %s2728_s26, 128 }
  0xae   : > { %p2214_p8 = scmp.ne.s32.totalorder %s2728_s26, %s2213_s27  ;;  %s2218_s5 = scalar_lea.hbm %s2992_s0, 256 }
  0xaf   : > { %p2219_p4 = scmp.lt.u32.totalorder %s2728_s26, %s2992_s0  ;;  %p2220_p12 = scmp.lt.u32.totalorder %s2218_s5, %s2213_s27 }
  0xb0   : > { %p2216_p1 = pnand %p2214_p8, %p2651_p6  ;;  %p2222_p9 = scmp.lt.u32.totalorder %s2213_s27, %s2728_s26 }
  0xb1   : > { %p2221_p3 = por %p2220_p12, %p2219_p4 }
  0xb2   : > { %p2217_p13 = pneg %p2216_p1 }
  0xb3   : > { %p2223_p0 = por %p2222_p9, %p2221_p3 }
  0xb5   : > { %p2224_p2 = pnand %p2223_p0, %p2217_p13 }
  0xb7   : > { %2227 = shalt.err (!%p2224_p2)
}
  0xb8   : > { %s2228_s12 = scalar_lea.vmem %s372_s9, 128  ;;  %s2414_s28 = smov [#allocation2]  }
  0xb9   : > { %p2229_p10 = scmp.ne.s32.totalorder %s372_s9, %s2228_s12  ;;  %s2233_s16 = sshll.u32 %s2414_s28, 4  ;;  %s2234_s16 = int_to_ptr.vmem [resolvable:$false] %s2233_s16 }
  0xba   : > { %s2235_s29 = scalar_lea.vmem %s2234_s16, 256  ;;  %p2236_p11 = scmp.lt.s32.totalorder %s372_s9, %s2234_s16 }
  0xbb   : > { %p2231_p5 = pnand %p2229_p10, %p2651_p6  ;;  %p2237_p8 = scmp.lt.s32.totalorder %s2235_s29, %s2228_s12 }
  0xbd   : > { %p2232_p7 = pneg %p2231_p5  ;;  %p2238_p1 = por %p2237_p8, %p2236_p11 }
  0xbf   : > { %p2239_p4 = pnand %p2238_p1, %p2232_p7 }
  0xc1   : > { %2242 = shalt.err (!%p2239_p4)
}
  0xc2   : > { %p3054_p12 = scmp.ne.s32.totalorder %s3045_s25, 0  ;;  %s2754_s27 = scalar_lea.hbm %s2994_s2, %s2624_s23 }
  0xc3   : > { %s400_s1 = scalar_lea.vmem [#allocation7], %s2621_s20  ;;  %s2243_s5 = scalar_lea.hbm %s2754_s27, 128 }
  0xc4   : > { %1968 = dma.hbm_to_vmem [thread:$0]  (!%p3054_p12), %s2728_s26, 128, %s372_s9, %s360_s13  }
  0xc5   : > { %s407_s21 = sshll.u32 %s400_s1, 4  ;;  %p2244_p13 = scmp.ne.s32.totalorder %s2754_s27, %s2243_s5  ;;  %s408_s21 = int_to_ptr.vmem [resolvable:$true] %s407_s21 }
  0xc6   : > { %s2248_s26 = scalar_lea.hbm %s2994_s2, 256  ;;  %p2249_p0 = scmp.lt.u32.totalorder %s2754_s27, %s2994_s2 }
  0xc7   : > { %p2246_p3 = pnand %p2244_p13, %p2651_p6  ;;  %p2250_p2 = scmp.lt.u32.totalorder %s2248_s26, %s2243_s5 }
  0xc8   : > { %p2252_p5 = scmp.lt.u32.totalorder %s2243_s5, %s2754_s27 }
  0xc9   : > { %p2247_p9 = pneg %p2246_p3  ;;  %p2251_p10 = por %p2250_p2, %p2249_p0 }
  0xcb   : > { %p2253_p7 = por %p2252_p5, %p2251_p10 }
  0xcd   : > { %p2254_p11 = pnand %p2253_p7, %p2247_p9 }
  0xcf   : > { %2257 = shalt.err (!%p2254_p11)
}
  0xd0   : > { %s2258_s12 = scalar_lea.vmem %s408_s21, 128  ;;  %s2415_s28 = smov [#allocation7]  }
  0xd1   : > { %p2259_p8 = scmp.ne.s32.totalorder %s408_s21, %s2258_s12  ;;  %s2263_s16 = sshll.u32 %s2415_s28, 4  ;;  %s2264_s16 = int_to_ptr.vmem [resolvable:$false] %s2263_s16 }
  0xd2   : > { %s2265_s29 = scalar_lea.vmem %s2264_s16, 256  ;;  %p2266_p13 = scmp.lt.s32.totalorder %s408_s21, %s2264_s16 }
  0xd3   : > { %p2261_p1 = pnand %p2259_p8, %p2651_p6  ;;  %p2267_p3 = scmp.lt.s32.totalorder %s2265_s29, %s2258_s12 }
  0xd5   : > { %p2262_p4 = pneg %p2261_p1  ;;  %p2268_p12 = por %p2267_p3, %p2266_p13 }
  0xd7   : > { %p2269_p0 = pnand %p2268_p12, %p2262_p4 }
  0xd9   : > { %2272 = shalt.err (!%p2269_p0)
}
  0xda   : > { %p3055_p2 = scmp.ne.s32.totalorder %s3045_s25, 0  ;;  %s2779_s1 = scalar_lea.hbm %s2995_s3, %s2624_s23 }
  0xdb   : > { %s418_s5 = scalar_lea.vmem [#allocation8], %s2621_s20  ;;  %s3056_s30 = sand.u32 1, %s2405_s14  }
  0xdc   : > { %1974 = dma.hbm_to_vmem [thread:$0]  (!%p3055_p2), %s2754_s27, 128, %s408_s21, %s2645_s4  }
  0xdd   : > { %s426_s24 = sshll.u32 %s418_s5, 4  ;;  %s415_s26 = scalar_lea.sflag [#allocation9], %s3056_s30  ;;  %s427_s24 = int_to_ptr.vmem [resolvable:$true] %s426_s24 }
  0xde   : > { %s2273_s9 = scalar_lea.hbm %s2779_s1, 128  ;;  %s2278_s21 = scalar_lea.hbm %s2995_s3, 256 }
  0xdf   : > { %p2274_p12 = scmp.ne.s32.totalorder %s2779_s1, %s2273_s9  ;;  %p2279_p5 = scmp.lt.u32.totalorder %s2779_s1, %s2995_s3 }
  0xe0   : > { %p2280_p7 = scmp.lt.u32.totalorder %s2278_s21, %s2273_s9  ;;  %p2282_p8 = scmp.lt.u32.totalorder %s2273_s9, %s2779_s1 }
  0xe1   : > { %p2276_p9 = pnand %p2274_p12, %p2651_p6 }
  0xe2   : > { %p2281_p11 = por %p2280_p7, %p2279_p5 }
  0xe3   : > { %p2277_p10 = pneg %p2276_p9 }
  0xe4   : > { %p2283_p1 = por %p2282_p8, %p2281_p11 }
  0xe6   : > { %p2284_p4 = pnand %p2283_p1, %p2277_p10 }
  0xe8   : > { %2287 = shalt.err (!%p2284_p4)
}
  0xe9   : > { %s2288_s20 = scalar_lea.vmem %s427_s24, 128  ;;  %s2416_s12 = smov [#allocation8]  }
  0xea   : > { %p2289_p13 = scmp.ne.s32.totalorder %s427_s24, %s2288_s20  ;;  %s2293_s28 = sshll.u32 %s2416_s12, 4  ;;  %s2294_s28 = int_to_ptr.vmem [resolvable:$false] %s2293_s28 }
  0xeb   : > { %s2295_s16 = scalar_lea.vmem %s2294_s28, 256  ;;  %p2296_p12 = scmp.lt.s32.totalorder %s427_s24, %s2294_s28 }
  0xec   : > { %p2291_p3 = pnand %p2289_p13, %p2651_p6  ;;  %p2297_p9 = scmp.lt.s32.totalorder %s2295_s16, %s2288_s20 }
  0xee   : > { %p2292_p0 = pneg %p2291_p3  ;;  %p2298_p2 = por %p2297_p9, %p2296_p12 }
  0xf0   : > { %p2299_p5 = pnand %p2298_p2, %p2292_p0 }
  0xf2   : > { %2302 = shalt.err (!%p2299_p5)
}
  0xf3   : > { %p3057_p7 = scmp.ne.s32.totalorder %s3045_s25, 0  ;;  %p3058_p10 = scmp.ne.s32.totalorder %s3036_s19, 0 }
  0xf4   : > { %s2804_s18 = sand.u32 (!%p3058_p10), 1, %s2389_s10   ;;  %p3059_p6 = scmp.ne.s32.totalorder (!%p3058_p10), %s3033_s17, 0 }
  0xf5   : > { %1977 = dma.hbm_to_vmem [thread:$0]  (!%p3057_p7), %s2779_s1, 128, %s427_s24, %s415_s26  }
  0xf6   : > { %435 = sbr.rel (%p3058_p10) target bundleno = 2175 (0x87f), region = 56  ;;  %s2807_s29 = sshll.u32 (!%p3058_p10), %s2804_s18, 3 }
  0xf7   : > { %s438_s22 = scalar_lea.sflag (!%p3058_p10), [#allocation3], %s2804_s18  ;;  %s441_s8 = scalar_lea.vmem (!%p3058_p10), [#allocation2], %s2807_s29 }
  0xfd   : > { %2356 = dma.done.wait (%p3059_p6), %s438_s22, 128  }
  0xfe   : > { %2358 = vsyncadd (%p3059_p6), %s438_s22, 4294967168  ;;  %s446_s19 = sand.u32 1, %s2508_s15   ;;  %s450_s1 = scalar_lea.vmem [#allocation5], %s2807_s29 }
  0xff   : > { %s447_s25 = scalar_lea.sflag [#allocation6], %s446_s19 }
 0x100   : > { %2360 = dma.done.wait (%p3059_p6), %s447_s25, 256  }
 0x101   : > { %2362 = vsyncadd (%p3059_p6), %s447_s25, 4294967040  ;;  %s459_s5 = scalar_lea.vmem [#allocation7], %s2807_s29  ;;  %s465_s24 = scalar_lea.sflag [#allocation9], %s446_s19 }
 0x102   : > { %s468_s30 = scalar_lea.vmem [#allocation8], %s2807_s29 }
 0x103   : > { %2364 = dma.done.wait (%p3059_p6), %s465_s24, 128  }
 0x104   : > { %2366 = vsyncadd (%p3059_p6), %s465_s24, 4294967168  ;;  %p3060_p2 = scmp.eq.s32.totalorder %s2508_s15, 0 }
 0x106   : > { %2368 = dma.done.wait (%p3060_p2), [#allocation9], 512   ;;  %p3061_p11 = pmov %p3060_p2 }
 0x107   : > { %p3062_p8 = pmov %p3060_p2 }
 0x108   : > { %2370 = vsyncadd (%p3061_p11), [#allocation9], 4294966784 }
 0x109   : > { %2372 = dma.done.wait (%p3062_p8), [#allocation12], 1024   ;;  %p3063_p1 = pmov %p3060_p2 }
 0x10b   : > { %2374 = vsyncadd (%p3063_p1), [#allocation12], 4294966272  ;;  %p3064_p4 = pmov %p3063_p1 }
 0x10c   : > { %p3065_p13 = pmov %p3063_p1 }
 0x10d   : > { %2376 = dma.done.wait (%p3064_p4), [#allocation15], 512  }
 0x10e   : > { %2378 = vsyncadd (%p3065_p13), [#allocation15], 4294966784  ;;  %v2417_v0 = vmov 0.0|0.0   ;;  %vm2418_vm0 = vmmov 0   ;;  %v2419_v1 = vmov 0.0   ;;  %v616_v2 = vld [vmem:[#allocation11] sm:$0xff] }
 0x10f   : > { %1908 = vmatprep.subr.bf16.mxu1 %v2417_v0  ;;  %1902 = vmatprep.subr.bf16.mxu0 %v2417_v0  ;;  %v617_v3 = vld [vmem:[#allocation11 + $0x8] sm:$0xff]  ;;  %v537_v4 = vld [vmem:[#allocation10] sm:$0xff]  ;;  %v618_v7 = vld [vmem:[#allocation11 + $0x10] sm:$0xff]  ;;  %vm541_vm1 = vcmask 261120   ;;  %vm772_vm2 = vcmask 64512   ;;  %s2420_s15 = smov 120  }
 0x110   : > { %1837 = vmatprep.mubr.msk.f32.mxu1 %vm2418_vm0, %v2419_v1  ;;  %1826 = vmatprep.mubr.msk.f32.mxu0 %vm2418_vm0, %v2419_v1  ;;  %v1909_v5 = vpack.c.bf16 %v617_v3, %v616_v2  ;;  %v538_v6 = vld [vmem:[#allocation10 + $0x8] sm:$0xff]  ;;  %v619_v8 = vld [vmem:[#allocation11 + $0x18] sm:$0xff]  ;;  %v539_v10 = vld [vmem:[#allocation10 + $0x10] sm:$0xff]  ;;  %s2421_s17 = smov 112   ;;  %s2422_s26 = smov 104   ;;  %vm1446_vm4 = vcmask 130048  }
 0x111   : > { %v1903_v9 = vpack.c.bf16 %v538_v6, %v537_v4  ;;  %v540_v11 = vld [vmem:[#allocation10 + $0x18] sm:$0xff]  ;;  %v1912_v12 = vpack.c.bf16 %v619_v8, %v618_v7  ;;  %v534_v15 = vld [vmem:[%s441_s8] sm:$0xff]  ;;  %v695_v23 = vld [vmem:[#allocation13 + $0x10] sm:$0xff]  ;;  %s2423_s9 = smov 8   ;;  %s2424_s4 = smov 16   ;;  %vm1448_vm5 = vcmask 195584  }
 0x112   : > { %1910 = vmatpush3.bf16.msra.mxu1 %v1909_v5  ;;  %v1906_v13 = vpack.c.bf16 %v540_v11, %v539_v10  ;;  %v535_v14 = vld [vmem:[%s450_s1] sm:$0xff]  ;;  %v693_v21 = vld [vmem:[#allocation13] sm:$0xff]  ;;  %v694_v22 = vld [vmem:[#allocation13 + $0x8] sm:$0xff]  ;;  %s3066_s27 = sld [smem:[#allocation25_spill]]  ;;  %s2425_s21 = smov 24  }
 0x113   : > { %1904 = vmatpush3.bf16.msra.mxu0 %v1903_v9  ;;  %1911 = vmatprep.subr.bf16.mxu1 %v2417_v0  ;;  %v1915_v24 = vpack.c.bf16 %v694_v22, %v693_v21  ;;  %v696_v25 = vld [vmem:[#allocation13 + $0x18] sm:$0xff]  ;;  %v536_v27 = vld [vmem:[%s459_s5] sm:$0xff]  ;;  %s3067_s23 = sld [smem:[#allocation29_spill]]  ;;  %s533_s16 = scalar_lea.vmem [#allocation16], %s2807_s29 }
 0x114   : > { %1905 = vmatprep.subr.bf16.mxu0 %v2417_v0  ;;  %v1918_v26 = vpack.c.bf16 %v696_v25, %v695_v23  ;;  %v770_v28 = vld [vmem:[%s468_s30] sm:$0xff]  ;;  %s3068_s12 = sld [smem:[#allocation34_spill]]  ;;  %s1550_s22 = sshll.u32 %s533_s16, 4  ;;  %s2944_s22 = int_to_ptr.vmem [resolvable:$true] %s1550_s22 }
 0x115   : > { %vm771_vm3 = vcmp.ne.s32.totalorder %v770_v28, 0  ;;  %v1450_v28 = vld [vmem:[#allocation14] sm:$0xff]  ;;  %s3069_s25 = sld [smem:[#allocation35_spill]]  ;;  %s1536_s5 = scalar_lea.sflag [#allocation4], %s2804_s18 }
 0x116   : > { %1913 = vmatpush3.bf16.msra.mxu1 %v1912_v12  ;;  %s2303_s24 = scalar_lea.vmem %s2944_s22, 128  ;;  %s2426_s29 = smov [#allocation16]  }
 0x117   : > { %1907 = vmatpush3.bf16.msra.mxu0 %v1906_v13  ;;  %1851 = vmatprep.subr.mxu1 %v2419_v1  ;;  %p2304_p3 = scmp.ne.s32.totalorder %s2944_s22, %s2303_s24  ;;  %s2307_s30 = sshll.u32 %s2426_s29, 4  ;;  %s2308_s30 = int_to_ptr.vmem [resolvable:$false] %s2307_s30 }
 0x118   : > { %1914 = vmatprep.subr.bf16.mxu0 %v2417_v0  ;;  %s1779_s28 = sshll.u32 %s3066_s27, 7  ;;  %p2310_p5 = scmp.lt.s32.totalorder %s2944_s22, %s2308_s30 }
 0x119   : > { %1838 = vmatmul.mubr.msk.f32.vlgmr.msra.gmra.mrb[0].mxu1 %vm541_vm1, %v535_v14  ;;  %p3070_p0 = scmp.ne.s32.totalorder %s3067_s23, 0 }
 0x11a   : > { %1827 = vmatmul.mubr.msk.f32.vlgmr.msra.gmra.mrb[0].mxu0 %vm541_vm1, %v534_v15  ;;  %1853 = vmatprep.mubr.msk.f32.mxu1 %vm2418_vm0, %v2419_v1 }
 0x11b   : > { %1848 = vmatprep.mubr.msk.f32.mxu0 %vm2418_vm0, %v2419_v1  ;;  %1916 = vmatpush3.bf16.msra.mxu0 %v1915_v24  ;;  %s2942_s1 = scalar_lea.hbm %s3069_s25, %s1779_s28  ;;  %p2305_p12 = pnand %p2304_p3, %p3070_p0 }
 0x11c   : > { %1917 = vmatprep.subr.bf16.mxu0 %v2417_v0 }
 0x11d   : > { %p2306_p9 = pneg %p2305_p12 }
 0x11f   : > { %1919 = vmatpush3.bf16.msra.mxu0 %v1918_v26 }
 0x120   : > { %1871 = vmatprep.subr.mxu0 %v2419_v1 }
 0x122   : > { %1849 = vmatmul.mubr.msk.f32.vlgmr.msra.gmra.mrb[2].mxu0 %vm541_vm1, %v536_v27 }
 0x123   : > { %1873 = vmatprep.mubr.msk.f32.mxu0 %vm2418_vm0, %v2419_v1 }
 0x1ec   : > { %v689_v16 = vpop.f32.mrb[0].mxu1 }
 0x1ed   : > { %936 = vrot.lane.b32.xlu1 %v689_v16, %s2420_s15  ;;  %v611_v17 = vpop.f32.mrb[0].mxu0  ;;  %v1839_v18 = vpop.f32.mrb[1].mxu1  ;;  %1852 = vmatpush3.xpose.msk.msra.mxu1 %vm772_vm2, %v689_v16 }
 0x1ee   : > { %v615_v19 = vmul.f32 0.17677669, %v611_v17  ;;  %v1828_v20 = vpop.f32.mrb[1].mxu0  ;;  %1856 = vmatprep.subr.mxu1 %v2419_v1 }
 0x1f0   : > { %1854 = vmatmul.mubr.msk.f32.vlgmr.msra.gmra.mrb[2].mxu1 %vm772_vm2, %v615_v19 }
 0x1f1   : > { %934 = vrot.lane.b32.xlu1 %v615_v19, %s2420_s15  ;;  %1858 = vmatprep.mubr.msk.f32.mxu1 %vm2418_vm0, %v2419_v1 }
 0x1f5   : > { %1101 = vrot.lane.b32.xlu1 %v615_v19, %s2421_s17  ;;  %v2881_v38 = vpop.f32.mrb[2].mxu0 }
 0x1f6   : > { %v1850_v39 = vpop.f32.mrb[3].mxu0  ;;  %1857 = vmatpush3.msra.mxu1 %v2881_v38 }
 0x1f7   : > { %1861 = vmatprep.subr.mxu1 %v2419_v1 }
 0x1f9   : > { %1269 = vrot.lane.b32.xlu1 %v689_v16, %s2422_s26 }
 0x1fd   : > { %1267 = vrot.lane.b32.xlu1 %v615_v19, %s2422_s26 }
 0x25f   : > { %v937_v40 = vpop.permute.xlu1 %936 }
 0x263   : > { %v935_v41 = vpop.permute.xlu1 %934 }
 0x267   : > { %v1102_v42 = vpop.permute.xlu1 %1101 }
 0x26b   : > { %v1270_v45 = vpop.permute.xlu1 %1269 }
 0x26f   : > { %v1268_v47 = vpop.permute.xlu1 %1267 }
 0x2c3   : > { %v845_v29 = vpop.f32.mrb[2].mxu1 }
 0x2c4   : > { %v849_v30 = vsel %vm771_vm3, %v845_v29, -1e+20  ;;  %v1855_v31 = vpop.f32.mrb[3].mxu1  ;;  %v1451_v29 = vld [vmem:[#allocation14 + $0x8] sm:$0xff] }
 0x2c5   : > { %v850_v32 = vsel %vm772_vm2, %v849_v30, -inf  ;;  %v1452_v31 = vld [vmem:[#allocation14 + $0x10] sm:$0xff] }
 0x2c6   : > { %851 = vmax.xlane.f32.xlu0 %v850_v32  ;;  %v1453_v32 = vld [vmem:[#allocation14 + $0x18] sm:$0xff] }
 0x353   : > { %v852_v33 = vpop.xlane.xlu0 %851 }
 0x354   : > { %v853_v34 = vsub.f32 %v849_v30, %v852_v33  ;;  %v1921_v30 = vpack.c.bf16 %v1451_v29, %v1450_v28  ;;  %v1924_v33 = vpack.c.bf16 %v1453_v32, %v1452_v31 }
 0x356   : > { %v854_v35 = vmul.f32 1.442695, %v853_v34 }
 0x358   : > { %2055 = vpow2.f32 %v854_v35 }
 0x362   : > { %v2056_v36 = vpop.eup %2055 }
 0x363   : > { %v856_v37 = vsel %vm772_vm2, %v2056_v36, 0.0 }
 0x364   : > { %857 = vadd.xlane.f32.xlu0 %v856_v37 }
 0x37a   : > { %1103 = vrot.lane.b32.xlu0 %v689_v16, %s2421_s17 }
 0x3f1   : > { %v858_v43 = vpop.xlane.xlu0 %857 }
 0x3f2   : > { %2057 = vrcp.f32 %v858_v43 }
 0x3f5   : > { %v1104_v44 = vpop.permute.xlu0 %1103 }
 0x3f6   : > { %1872 = vmatpush3.xpose.msk.msra.mxu0 %vm772_vm2, %v1104_v44  ;;  %v1776_v44 = vld [vmem:[%s3068_s12] ss:$0 sm:$0xff] }
 0x3f7   : > { %1881 = vmatprep.subr.mxu0 %v2419_v1 }
 0x3f9   : > { %1874 = vmatmul.mubr.msk.f32.vlgmr.msra.gmra.mrb[4].mxu0 %vm772_vm2, %v1102_v42 }
 0x3fa   : > { %1882 = vmatpush3.xpose.msk.msra.mxu0 %vm772_vm2, %v1270_v45  ;;  %1883 = vmatprep.mubr.msk.f32.mxu0 %vm2418_vm0, %v2419_v1 }
 0x3fb   : > { %1920 = vmatprep.subr.bf16.mxu0 %v2417_v0 }
 0x3fc   : > { %v2058_v46 = vpop.eup %2057 }
 0x3fd   : > { %v860_v48 = vmul.f32 %v2058_v46, %v2056_v36  ;;  %1884 = vmatmul.mubr.msk.f32.vlgmr.msra.gmra.mrb[6].mxu0 %vm772_vm2, %v1268_v47 }
 0x3fe   : > { %1899 = vmatprep.mubr.msk.f32.mxu0 %vm2418_vm0, %v2419_v1  ;;  %1922 = vmatpush3.bf16.msra.mxu0 %v1921_v30 }
 0x3ff   : > { %1859 = vmatmul.mubr.msk.f32.vlgmr.msra.gmra.mrb[4].mxu1 %vm772_vm2, %v860_v48  ;;  %1923 = vmatprep.subr.bf16.mxu0 %v2417_v0 }
 0x400   : > { %1862 = vmatpush3.xpose.msk.msra.mxu1 %vm772_vm2, %v937_v40  ;;  %1863 = vmatprep.mubr.msk.f32.mxu1 %vm2418_vm0, %v2419_v1 }
 0x401   : > { %1866 = vmatprep.subr.mxu1 %v2419_v1 }
 0x402   : > { %1925 = vmatpush3.bf16.msra.mxu0 %v1924_v33 }
 0x403   : > { %1864 = vmatmul.mubr.msk.f32.vlgmr.msra.gmra.mrb[6].mxu1 %vm772_vm2, %v935_v41 }
 0x404   : > { %1868 = vmatprep.mubr.msk.f32.mxu1 %vm2418_vm0, %v2419_v1 }
 0x4cc   : > { %v1175_v49 = vpop.f32.mrb[4].mxu0 }
 0x4cd   : > { %v1179_v50 = vsel %vm771_vm3, %v1175_v49, -1e+20  ;;  %v1875_v51 = vpop.f32.mrb[5].mxu0 }
 0x4ce   : > { %v1180_v52 = vsel %vm772_vm2, %v1179_v50, -inf }
 0x4cf   : > { %1181 = vmax.xlane.f32.xlu0 %v1180_v52 }
 0x4d0   : > { %v1341_v53 = vpop.f32.mrb[6].mxu0 }
 0x4d1   : > { %v1885_v54 = vpop.f32.mrb[7].mxu0  ;;  %v1345_v61 = vsel %vm771_vm3, %v1341_v53, -1e+20 }
 0x4d2   : > { %v2906_v55 = vpop.f32.mrb[4].mxu1  ;;  %v1346_v62 = vsel %vm772_vm2, %v1345_v61, -inf }
 0x4d3   : > { %v1860_v56 = vpop.f32.mrb[5].mxu1 }
 0x4d6   : > { %v1008_v57 = vpop.f32.mrb[6].mxu1 }
 0x4d7   : > { %v1012_v58 = vsel %vm771_vm3, %v1008_v57, -1e+20  ;;  %v1865_v59 = vpop.f32.mrb[7].mxu1 }
 0x4d8   : > { %v1013_v60 = vsel %vm772_vm2, %v1012_v58, -inf }
 0x4d9   : > { %1014 = vmax.xlane.f32.xlu1 %v1013_v60 }
 0x4dd   : > { %1347 = vmax.xlane.f32.xlu1 %v1346_v62 }
 0x55c   : > { %v1182_v63 = vpop.xlane.xlu0 %1181 }
 0x55d   : > { %v1183_v2 = vsub.f32 %v1179_v50, %v1182_v63 }
 0x55f   : > { %v1184_v3 = vmul.f32 1.442695, %v1183_v2 }
 0x561   : > { %2059 = vpow2.f32 %v1184_v3 }
 0x566   : > { %v1015_v4 = vpop.xlane.xlu1 %1014 }
 0x567   : > { %v1016_v12 = vsub.f32 %v1012_v58, %v1015_v4 }
 0x569   : > { %v1017_v13 = vmul.f32 1.442695, %v1016_v12 }
 0x56a   : > { %v1348_v5 = vpop.xlane.xlu1 %1347 }
 0x56b   : > { %v2060_v6 = vpop.eup %2059  ;;  %v1349_v7 = vsub.f32 %v1345_v61, %v1348_v5 }
 0x56c   : > { %v1186_v8 = vsel %vm772_vm2, %v2060_v6, 0.0 }
 0x56d   : > { %v1350_v9 = vmul.f32 1.442695, %v1349_v7  ;;  %1187 = vadd.xlane.f32.xlu0 %v1186_v8 }
 0x56f   : > { %2061 = vpow2.f32 %v1350_v9 }
 0x570   : > { %2063 = vpow2.f32 %v1017_v13 }
 0x579   : > { %v2062_v10 = vpop.eup %2061 }
 0x57a   : > { %v1352_v11 = vsel %vm772_vm2, %v2062_v10, 0.0  ;;  %v2064_v14 = vpop.eup %2063 }
 0x57b   : > { %1353 = vadd.xlane.f32.xlu1 %v1352_v11  ;;  %v1019_v15 = vsel %vm772_vm2, %v2064_v14, 0.0 }
 0x583   : > { %1025 = vrot.lane.b32.xlu0 %v2881_v38, %s2420_s15  ;;  %s2309_s15 = scalar_lea.vmem %s2308_s30, 256 }
 0x584   : > { %p2311_p7 = scmp.lt.s32.totalorder %s2309_s15, %s2303_s24 }
 0x586   : > { %p2312_p10 = por %p2311_p7, %p2310_p5 }
 0x588   : > { %p2313_p6 = pnand %p2312_p10, %p2306_p9 }
 0x58c   : > { %1191 = vrot.lane.b32.xlu1 %v2881_v38, %s2421_s17 }
 0x5b0   : > { %1020 = vadd.xlane.f32.xlu1 %v1019_v15 }
 0x5c1   : > { %1357 = vrot.lane.b32.xlu1 %v2881_v38, %s2422_s26 }
 0x5fa   : > { %v1188_v16 = vpop.xlane.xlu0 %1187 }
 0x5fe   : > { %v1026_v17 = vpop.permute.xlu0 %1025 }
 0x5ff   : > { %1867 = vmatpush3.msra.mxu1 %v1026_v17 }
 0x600   : > { %1876 = vmatprep.subr.mxu1 %v2419_v1 }
 0x608   : > { %v1354_v18 = vpop.xlane.xlu1 %1353 }
 0x60c   : > { %v1192_v19 = vpop.permute.xlu1 %1191 }
 0x63d   : > { %v1021_v20 = vpop.xlane.xlu1 %1020 }
 0x63e   : > { %2065 = vrcp.f32 %v1021_v20 }
 0x63f   : > { %2067 = vrcp.f32 %v1188_v16 }
 0x640   : > { %2069 = vrcp.f32 %v1354_v18 }
 0x641   : > { %v1358_v26 = vpop.permute.xlu1 %1357 }
 0x648   : > { %v2066_v21 = vpop.eup %2065 }
 0x649   : > { %v1023_v22 = vmul.f32 %v2066_v21, %v2064_v14  ;;  %v2068_v23 = vpop.eup %2067 }
 0x64a   : > { %v1190_v24 = vmul.f32 %v2068_v23, %v2060_v6  ;;  %v2070_v25 = vpop.eup %2069 }
 0x64b   : > { %1869 = vmatmul.mubr.msk.f32.vlgmr.msra.gmra.mrb[8].mxu1 %vm772_vm2, %v1023_v22  ;;  %v1356_v27 = vmul.f32 %v2070_v25, %v2062_v10 }
 0x64c   : > { %1877 = vmatpush3.msra.mxu1 %v1192_v19  ;;  %1878 = vmatprep.mubr.msk.f32.mxu1 %vm2418_vm0, %v2419_v1 }
 0x64d   : > { %1886 = vmatprep.subr.mxu1 %v2419_v1 }
 0x64f   : > { %1879 = vmatmul.mubr.msk.f32.vlgmr.msra.gmra.mrb[10].mxu1 %vm772_vm2, %v1190_v24 }
 0x650   : > { %1887 = vmatpush3.msra.mxu1 %v1358_v26  ;;  %1888 = vmatprep.mubr.msk.f32.mxu1 %vm2418_vm0, %v2419_v1 }
 0x653   : > { %1889 = vmatmul.mubr.msk.f32.vlgmr.msra.gmra.mrb[12].mxu1 %vm772_vm2, %v1356_v27 }
 0x71e   : > { %v1097_v34 = vpop.f32.mrb[8].mxu1 }
 0x71f   : > { %1434 = vrot.lane.b32.xlu0 %v1097_v34, %s2423_s9  ;;  %v1870_v35 = vpop.f32.mrb[9].mxu1 }
 0x722   : > { %v1263_v36 = vpop.f32.mrb[10].mxu1 }
 0x723   : > { %1438 = vrot.lane.b32.xlu1 %v1263_v36, %s2424_s4  ;;  %v1880_v1 = vpop.f32.mrb[11].mxu1 }
 0x726   : > { %v1429_v37 = vpop.f32.mrb[12].mxu1 }
 0x727   : > { %1442 = vrot.lane.b32.xlu0 %v1429_v37, %s2425_s21  ;;  %v1890_v38 = vpop.f32.mrb[13].mxu1 }
 0x791   : > { %v1435_v39 = vpop.permute.xlu0 %1434 }
 0x792   : > { %v1445_v40 = vsel %vm772_vm2, %v2906_v55, %v1435_v39 }
 0x795   : > { %v1439_v0 = vpop.permute.xlu1 %1438 }
 0x796   : > { %v1447_v41 = vsel %vm1446_vm4, %v1445_v40, %v1439_v0 }
 0x799   : > { %v1443_v42 = vpop.permute.xlu0 %1442 }
 0x79a   : > { %v1449_v43 = vsel %vm1448_vm5, %v1447_v41, %v1443_v42 }
 0x79b   : > { %1900 = vmatmul.mubr.msk.f32.vlgmr.msra.gmra.mrb[8].mxu0 %vm541_vm1, %v1449_v43 }
 0x86e   : > { %v1530_v45 = vpop.f32.mrb[8].mxu0 }
 0x86f   : > { %v1531_v46 = vadd.f32 %v1776_v44, %v1530_v45  ;;  %v1901_v47 = vpop.f32.mrb[9].mxu0 }
 0x871   : > { %1534 = vst.msk [vmem:[%s533_s16] sm:$0xff] %vm541_vm1, %v1531_v46 }
 0x872   : > { %2316 = shalt.err (!%p2313_p6)
}
 0x873   : > { %s2317_s18 = scalar_lea.hbm %s2942_s1, 128  ;;  %s2321_s9 = scalar_lea.hbm %s3069_s25, 256 }
 0x874   : > { %p2318_p2 = scmp.ne.s32.totalorder %s2942_s1, %s2317_s18  ;;  %p2322_p1 = scmp.lt.u32.totalorder %s2942_s1, %s3069_s25 }
 0x875   : > { %p2323_p4 = scmp.lt.u32.totalorder %s2321_s9, %s2317_s18  ;;  %p2325_p3 = scmp.lt.u32.totalorder %s2317_s18, %s2942_s1 }
 0x876   : > { %p2319_p11 = pnand %p2318_p2, %p3070_p0 }
 0x877   : > { %p2324_p13 = por %p2323_p4, %p2322_p1 }
 0x878   : > { %p2320_p8 = pneg %p2319_p11 }
 0x879   : > { %p2326_p12 = por %p2325_p3, %p2324_p13 }
 0x87b   : > { %p2327_p9 = pnand %p2326_p12, %p2320_p8 }
 0x87d   : > { %2330 = shalt.err (!%p2327_p9)
}
 0x87e   : > { %1950 = dma.vmem_to_hbm [thread:$0]  (%p3070_p0), %s2944_s22, 128, %s2942_s1, %s1536_s5  }
 0x87f PF: > { %s3071_s21 = sld [smem:[#allocation24_spill]]  ;;  %s3072_s13 = sld [smem:[#allocation27_spill]] }
 0x880   : > { %p3074_p7 = scmp.ge.s32.totalorder %s2405_s14, 2 }
 0x885   : > { %s1562_s20 = sand.u32 1, %s3071_s21   ;;  %p3073_p5 = scmp.ne.s32.totalorder %s3072_s13, 0 }
 0x886   : > { %s1563_s12 = scalar_lea.sflag [#allocation4], %s1562_s20 }
 0x887   : > { %p1979_p10 = pnand %p3074_p7, %p3073_p5 }
 0x889   : > { %2380 = dma.done.wait (!%p1979_p10), %s1563_s12, 128  }
 0x88a   : > { %2382 = vsyncadd (!%p1979_p10), %s1563_s12, 4294967168  ;;  %s33_s14 = sadd.s32 1, %s2405_s14   ;;  %s3075_s23 = sld [smem:[#allocation30_spill]] }
 0x88b   : > { %p30_p6 = scmp.ge.s32.totalorder %s33_s14, 4   ;;  %s3076_s12 = sld [smem:[#allocation26_spill]] }
 0x88c   : > { %s3077_s13 = sld [smem:[#allocation28_spill]]  ;;  %s3078_s30 = smov %s2389_s10 }
 0x88d   : > { %s3079_s10 = smov %s2393_s11  ;;  %32 = sbr.rel (!%p30_p6) target bundleno = 18 (0x12), region = 154 }
 0x890   : > { %s3080_s11 = smov %s3075_s23 }
 0x894   :  { %1568 = vsyncpa [#allocation3], 1 }
 0x895   :  { %1570 = vsyncpa [#allocation3 + $0x1], 1 }
 0x896   :  { %1571 = vsyncpa [#allocation6], 1 }
 0x897   :  { %1573 = vsyncpa [#allocation6 + $0x1], 1 }
 0x898   :  { %1574 = vsyncpa [#allocation9], 1 }
 0x899   :  { %1576 = vsyncpa [#allocation9 + $0x1], 1 }
 0x89a   :  { %1577 = vsyncpa [#allocation12], 1 }
 0x89b   :  { %1578 = vsyncpa [#allocation15], 1 }
 0x89c   :  { %1579 = vsyncpa [#allocation4], 1 }
 0x89d   :  { %1581 = vsyncpa [#allocation4 + $0x1], 1 }

</bundles_post_ra>
